<compile_context>
chip_gen: v6e
topology: v6e:2x2x1
jax: 0.10.0
libtpu: 0.0.40
codegen_flags: <defaults>
</compile_context>

<pallas_src>
import jax
import jax.numpy as jnp
from jax.experimental import pallas as pl
from jax.experimental.pallas import tpu as pltpu


def _round_up(x, m):
    return (x + m - 1) // m * m


def _ffn_kernel(x_ref, w1_ref, b1_ref, w2_ref, b2_ref, o_ref):
    """One (TM, H) tile of tokens; weights/biases are full-size residents."""
    mm_dtype = w1_ref.dtype                           # bf16 (or f32) MXU operand dtype
    x = x_ref[...]                                    # (TM, H) io dtype
    # Hidden layer: MXU matmul with f32 accumulation, f32 bias+ReLU epilogue.
    h = jnp.dot(x.astype(mm_dtype), w1_ref[...],
                preferred_element_type=jnp.float32)   # (TM, Hp)
    h = jnp.maximum(h + b1_ref[...], 0.0)
    # Output layer + bias + residual, f32 epilogue.
    y = jnp.dot(h.astype(mm_dtype), w2_ref[...],
                preferred_element_type=jnp.float32)   # (TM, H)
    o_ref[...] = (y + b2_ref[...] + x.astype(jnp.float32)).astype(o_ref.dtype)


def pointwise_feed_forward(x, w1, b1, w2, b2, *, tile_m=4096,
                           use_bf16_matmul=True,
                           vmem_budget_bytes=28 * 1024 * 1024):
    """x: (B, L, H).  w1/w2: (H_out, H_in[, 1]) Conv1d(kernel_size=1) weights.
    b1/b2: (H,).  Eval-mode forward.  Output dtype == x.dtype (pass bf16
    activations to stream bf16; residual then carries bf16-quantized x)."""
    if w1.ndim == 3:
        w1 = w1[..., 0]
    if w2.ndim == 3:
        w2 = w2[..., 0]

    B, L, H = x.shape
    M = B * L
    Hp = _round_up(max(H, 1), 128)                    # lane-dense hidden/contraction dim
    mm_dtype = jnp.bfloat16 if use_bf16_matmul else jnp.float32
    mm_isz = jnp.dtype(mm_dtype).itemsize
    io_isz = jnp.dtype(x.dtype).itemsize

    # Pre-transpose + zero-pad only the weights (hidden dim -> Hp); X/out stay at H.
    w1_t = jnp.zeros((H, Hp), mm_dtype).at[:, :H].set(
        jnp.transpose(w1).astype(mm_dtype))           # (H_in, Hp)
    w2_t = jnp.zeros((Hp, H), mm_dtype).at[:H, :].set(
        jnp.transpose(w2).astype(mm_dtype))           # (Hp, H_out)
    b1_r = jnp.zeros((1, Hp), jnp.float32).at[:, :H].set(
        b1.astype(jnp.float32).reshape(1, H))
    b2_r = b2.astype(jnp.float32).reshape(1, H)

    # Row tile: as large as the VMEM budget allows (amortizes ~0.35us/step),
    # multiple of 8, capped at ceil(M/2) so there are >=2 grid steps (v7x megacore).
    row_align = 8
    tm_cap = _round_up(pl.cdiv(M, 2), row_align)
    tm = max(row_align, min(_round_up(tile_m, row_align), tm_cap))

    def vmem_need(t):
        wgt = 2 * H * Hp * mm_isz + (Hp + H) * 4              # resident weights + biases
        stream = 2 * (t * H * io_isz) * 2                     # x + out tiles, double-buffered
        live = t * Hp * 4 + t * Hp * mm_isz + 2 * t * H * 4   # h(f32), h(mm), y, x_f32
        return wgt + stream + live

    while tm > row_align and vmem_need(tm) > vmem_budget_bytes:
        tm = max(row_align, _round_up(tm // 2, row_align))

    grid = (pl.cdiv(M, tm),)                          # partial last block handled by Pallas
    x2d = x.reshape(M, H)                             # free reshape, no pad pass

    const = dict(pipeline_mode=pl.Buffered(1))        # resident, never re-fetched
    cost = pl.CostEstimate(
        flops=4 * M * H * Hp,
        transcendentals=0,
        bytes_accessed=2 * M * H * io_isz + 2 * H * Hp * mm_isz + (Hp + H) * 4,
    )
    vmem_limit = int(min(max(vmem_need(tm) + (4 << 20), 16 << 20), 56 << 20))

    out2d = pl.pallas_call(
        _ffn_kernel,
        out_shape=jax.ShapeDtypeStruct((M, H), x.dtype),
        grid_spec=pltpu.PrefetchScalarGridSpec(
            num_scalar_prefetch=0,
            grid=grid,
            in_specs=[
                pl.BlockSpec((tm, H), lambda i: (i, 0)),              # X tile (streamed)
                pl.BlockSpec((H, Hp), lambda i: (0, 0), **const),     # W1^T
                pl.BlockSpec((1, Hp), lambda i: (0, 0), **const),     # b1
                pl.BlockSpec((Hp, H), lambda i: (0, 0), **const),     # W2^T
                pl.BlockSpec((1, H), lambda i: (0, 0), **const),      # b2
            ],
            out_specs=pl.BlockSpec((tm, H), lambda i: (i, 0)),
        ),
        compiler_params=pltpu.CompilerParams(
            dimension_semantics=("parallel",),        # shards across v7x's 2 TCs
            vmem_limit_bytes=vmem_limit,
        ),
        cost_estimate=cost,
    )(x2d, w1_t, b1_r, w2_t, b2_r)

    return out2d.reshape(B, L, H)


def reference(x, w1, b1, w2, b2):
    # Pure-JAX reference mirroring the PyTorch forward (eval mode).
    h = jnp.einsum("blh,oh->blo", x, w1) + b1
    h = jnp.maximum(h, 0.0)
    y = jnp.einsum("blh,oh->blo", h, w2) + b2
    return y + x


if __name__ == "__main__":
    key = jax.random.PRNGKey(0)
    kx, kw1, kb1, kw2, kb2 = jax.random.split(key, 5)

    # Small SASRec-ish shapes: batch=2, seq=8, hidden=32.
    B, L, H = 2, 8, 32
    x = jax.random.normal(kx, (B, L, H), dtype=jnp.float32)
    # nn.Conv1d(H, H, kernel_size=1) weight is (H_out, H_in, 1); kernel dim squeezed.
    w1 = jax.random.normal(kw1, (H, H), dtype=jnp.float32) * 0.1
    b1 = jax.random.normal(kb1, (H,), dtype=jnp.float32) * 0.1
    w2 = jax.random.normal(kw2, (H, H), dtype=jnp.float32) * 0.1
    b2 = jax.random.normal(kb2, (H,), dtype=jnp.float32) * 0.1

    ref = reference(x, w1, b1, w2, b2)

    # Exact-precision path (f32 MXU operands, f32 io) — matches reference tightly.
    out_f32 = jax.block_until_ready(
        pointwise_feed_forward(x, w1, b1, w2, b2, use_bf16_matmul=False))
    assert out_f32.shape == (B, L, H)
    assert jnp.allclose(out_f32, ref, atol=1e-5, rtol=1e-5), "f32 path mismatch"

    # Fast path (bf16 MXU operands, f32 accumulation/epilogue, f32 io).
    out_bf16 = jax.block_until_ready(
        pointwise_feed_forward(x, w1, b1, w2, b2, use_bf16_matmul=True))
    assert jnp.allclose(out_bf16, ref, atol=5e-2, rtol=5e-2), "bf16 matmul mismatch"

    # bf16-streamed activations: io dtype follows x.dtype (halves streamed HBM bytes).
    x_bf = x.astype(jnp.bfloat16)
    out_bfio = jax.block_until_ready(
        pointwise_feed_forward(x_bf, w1, b1, w2, b2, use_bf16_matmul=True))
    assert out_bfio.dtype == jnp.bfloat16
    ref_bfio = reference(x_bf.astype(jnp.float32), w1, b1, w2, b2)
    assert jnp.allclose(out_bfio.astype(jnp.float32), ref_bfio,
                        atol=1e-1, rtol=1e-1), "bf16 io mismatch"

    # Ragged shape: M=150 not divisible by the row tile (partial last block) and H=48.
    B2, L2, H2 = 3, 50, 48
    x2 = jax.random.normal(kx, (B2, L2, H2), dtype=jnp.float32)
    w1b = jax.random.normal(kw1, (H2, H2), dtype=jnp.float32) * 0.1
    b1b = jax.random.normal(kb1, (H2,), dtype=jnp.float32) * 0.1
    w2b = jax.random.normal(kw2, (H2, H2), dtype=jnp.float32) * 0.1
    b2b = jax.random.normal(kb2, (H2,), dtype=jnp.float32) * 0.1
    out2 = jax.block_until_ready(
        pointwise_feed_forward(x2, w1b, b1b, w2b, b2b, use_bf16_matmul=False))
    ref2 = reference(x2, w1b, b1b, w2b, b2b)
    assert out2.shape == (B2, L2, H2)
    assert jnp.allclose(out2, ref2, atol=1e-5, rtol=1e-5), "ragged path mismatch"

    # Lane-aligned hidden size (H=128): fully lane-dense, multi-step parallel grid.
    B3, L3, H3 = 2, 64, 128
    x3 = jax.random.normal(kx, (B3, L3, H3), dtype=jnp.float32)
    w1c = jax.random.normal(kw1, (H3, H3), dtype=jnp.float32) * 0.05
    b1c = jax.random.normal(kb1, (H3,), dtype=jnp.float32) * 0.05
    w2c = jax.random.normal(kw2, (H3, H3), dtype=jnp.float32) * 0.05
    b2c = jax.random.normal(kb2, (H3,), dtype=jnp.float32) * 0.05
    out3 = jax.block_until_ready(
        pointwise_feed_forward(x3, w1c, b1c, w2c, b2c, use_bf16_matmul=False))
    ref3 = reference(x3, w1c, b1c, w2c, b2c)
    assert jnp.allclose(out3, ref3, atol=1e-5, rtol=1e-5), "aligned path mismatch"

    print("KERNEL_OK")
</pallas_src>

<mosaic_0001>
module attributes {stable_mosaic.version = 11 : i64} {
  func.func @_ffn_kernel(%arg0: i32, %arg1: memref<8x32xf32, #tpu.memory_space<vmem>>, %arg2: memref<32x128xf32, #tpu.memory_space<vmem>>, %arg3: memref<1x128xf32, #tpu.memory_space<vmem>>, %arg4: memref<128x32xf32, #tpu.memory_space<vmem>>, %arg5: memref<1x32xf32, #tpu.memory_space<vmem>>, %arg6: memref<8x32xf32, #tpu.memory_space<vmem>>) attributes {dimension_semantics = [#tpu.dimension_semantics<parallel>], iteration_bounds = array<i64: 2>, scalar_prefetch = 0 : i64, scratch_operands = 0 : i64, tpu.core_type = #tpu.core_type<tc>, window_params = [{transform_indices = @transform_0, window_bounds = array<i64: 8, 32>}, {pipeline_mode = #tpu.pipeline_mode<synchronous>, transform_indices = @transform_1, window_bounds = array<i64: 32, 128>}, {pipeline_mode = #tpu.pipeline_mode<synchronous>, transform_indices = @transform_2, window_bounds = array<i64: 1, 128>}, {pipeline_mode = #tpu.pipeline_mode<synchronous>, transform_indices = @transform_3, window_bounds = array<i64: 128, 32>}, {pipeline_mode = #tpu.pipeline_mode<synchronous>, transform_indices = @transform_4, window_bounds = array<i64: 1, 32>}, {transform_indices = @transform_5, window_bounds = array<i64: 8, 32>}]} {
    %c0 = arith.constant 0 : index
    %c0_0 = arith.constant 0 : index
    %0 = vector.load %arg1[%c0, %c0_0] : memref<8x32xf32, #tpu.memory_space<vmem>>, vector<8x32xf32>
    %c0_1 = arith.constant 0 : index
    %c0_2 = arith.constant 0 : index
    %1 = vector.load %arg2[%c0_1, %c0_2] : memref<32x128xf32, #tpu.memory_space<vmem>>, vector<32x128xf32>
    %cst = arith.constant dense<0.000000e+00> : vector<8x128xf32>
    %2 = tpu.matmul %0, %1, %cst {dimension_numbers = #tpu.dot_dimension_numbers<[1], [0], [0], [1], [0, 0, 1, 1], [], []>} : vector<8x32xf32>, vector<32x128xf32>, vector<8x128xf32> -> vector<8x128xf32>
    %c0_3 = arith.constant 0 : index
    %c0_4 = arith.constant 0 : index
    %3 = vector.load %arg3[%c0_3, %c0_4] : memref<1x128xf32, #tpu.memory_space<vmem>>, vector<1x128xf32>
    %4 = vector.broadcast %3 : vector<1x128xf32> to vector<8x128xf32>
    %5 = arith.addf %2, %4 : vector<8x128xf32>
    %cst_5 = arith.constant 0.000000e+00 : f32
    %6 = vector.broadcast %cst_5 : f32 to vector<8x128xf32>
    %7 = arith.maximumf %5, %6 : vector<8x128xf32>
    %c0_6 = arith.constant 0 : index
    %c0_7 = arith.constant 0 : index
    %8 = vector.load %arg4[%c0_6, %c0_7] : memref<128x32xf32, #tpu.memory_space<vmem>>, vector<128x32xf32>
    %cst_8 = arith.constant dense<0.000000e+00> : vector<8x32xf32>
    %9 = tpu.matmul %7, %8, %cst_8 {dimension_numbers = #tpu.dot_dimension_numbers<[1], [0], [0], [1], [0, 0, 1, 1], [], []>} : vector<8x128xf32>, vector<128x32xf32>, vector<8x32xf32> -> vector<8x32xf32>
    %c0_9 = arith.constant 0 : index
    %c0_10 = arith.constant 0 : index
    %10 = vector.load %arg5[%c0_9, %c0_10] : memref<1x32xf32, #tpu.memory_space<vmem>>, vector<1x32xf32>
    %11 = vector.broadcast %10 : vector<1x32xf32> to vector<8x32xf32>
    %12 = arith.addf %9, %11 : vector<8x32xf32>
    %13 = arith.addf %12, %0 : vector<8x32xf32>
    %c0_11 = arith.constant 0 : index
    %c0_12 = arith.constant 0 : index
    %14 = vector.load %arg6[%c0_11, %c0_12] : memref<8x32xf32, #tpu.memory_space<vmem>>, vector<8x32xf32>
    tpu.vector_store %arg6[%c0_11, %c0_12], %13 {strides = array<i32>} : memref<8x32xf32, #tpu.memory_space<vmem>>, vector<8x32xf32>,
    return
  }
  func.func @transform_0(%arg0: i32) -> (i32, i32) {
    %c0_i32 = arith.constant 0 : i32
    %c0_i32_0 = arith.constant 0 : i32
    return %arg0, %c0_i32 : i32, i32
  }
  func.func @transform_1(%arg0: i32) -> (i32, i32) {
    %c0_i32 = arith.constant 0 : i32
    %c0_i32_0 = arith.constant 0 : i32
    %c0_i32_1 = arith.constant 0 : i32
    return %c0_i32, %c0_i32_0 : i32, i32
  }
  func.func @transform_2(%arg0: i32) -> (i32, i32) {
    %c0_i32 = arith.constant 0 : i32
    %c0_i32_0 = arith.constant 0 : i32
    %c0_i32_1 = arith.constant 0 : i32
    return %c0_i32, %c0_i32_0 : i32, i32
  }
  func.func @transform_3(%arg0: i32) -> (i32, i32) {
    %c0_i32 = arith.constant 0 : i32
    %c0_i32_0 = arith.constant 0 : i32
    %c0_i32_1 = arith.constant 0 : i32
    return %c0_i32, %c0_i32_0 : i32, i32
  }
  func.func @transform_4(%arg0: i32) -> (i32, i32) {
    %c0_i32 = arith.constant 0 : i32
    %c0_i32_0 = arith.constant 0 : i32
    %c0_i32_1 = arith.constant 0 : i32
    return %c0_i32, %c0_i32_0 : i32, i32
  }
  func.func @transform_5(%arg0: i32) -> (i32, i32) {
    %c0_i32 = arith.constant 0 : i32
    %c0_i32_0 = arith.constant 0 : i32
    return %arg0, %c0_i32 : i32, i32
  }
}

</mosaic_0001>

<bundles_post_ra>
// kernel: tpu_custom_call.1
= control target key start
LH: loop header
LB: loop body
LE: loop exit
PB: predicated region body
PF: predicated region fallthrough
CT: control target
= control target key end

     0   :  { %10 = vsyncpa [#allocation3], 0  ;;  %s871_s0 = inlined_call_operand.vmem [shape: f32[16,32], index: 0, kind: input, shape index: {}]   ;;  %s872_s1 = inlined_call_operand.vmem [shape: f32[32,128], index: 1, kind: input, shape index: {}]   ;;  %s873_s2 = inlined_call_operand.vmem [shape: f32[1,128], index: 2, kind: input, shape index: {}]   ;;  %s874_s3 = inlined_call_operand.vmem [shape: f32[128,32], index: 3, kind: input, shape index: {}]   ;;  %s875_s4 = inlined_call_operand.vmem [shape: f32[1,32], index: 4, kind: input, shape index: {}]   ;;  %s876_s5 = inlined_call_operand.hbm [shape: f32[16,32], index: 5, kind: output, shape index: {}]  }
   0x1   :  { %12 = vsyncpa [#allocation3 + $0x1], 0  ;;  %s692_s18 = smov 0   ;;  %s694_s19 = smov 0  }
   0x2   :  { %s696_s20 = smov 0   ;;  %s698_s21 = smov 0  }
   0x3 LB: > { %s713_s22 = sadd.s32 4294967295, %s657_s21   ;;  %s475_s23 = sadd.s32 4294967294, %s657_s21   ;;  %s657_s21 = sphi %s698_s21, %s882_s21   ;;  %s653_s20 = sphi %s696_s20, %s881_s20   ;;  %s649_s19 = sphi %s694_s19, %s880_s19   ;;  %s645_s18 = sphi %s692_s18, %s879_s18  }
   0x4   : > { %s717_s24 = sadd.s32 1, %s657_s21   ;;  %s135_s25 = sadd.s32 1, %s653_s20 }
   0x5   : > { %s132_s26 = ssub.s32 %s657_s21, %s717_s24  ;;  %p145_p0 = scmp.ne.s32.totalorder %s653_s20, %s649_s19 }
   0x6   : > { %p133_p1 = scmp.eq.s32.totalorder %s132_s26, 0  ;;  %p146_p2 = scmp.eq.s32.totalorder %s713_s22, 1 }
   0x7   : > { %p151_p3 = scmp.ne.s32.totalorder %s649_s19, %s645_s18  ;;  %p152_p4 = scmp.eq.s32.totalorder %s475_s23, 1 }
   0x8   : > { %s728_s27 = scalar_select %p133_p1, %s653_s20, %s135_s25  }
   0x9   : > { %p730_p5 = por %p146_p2, %p145_p0  ;;  %p734_p6 = por %p152_p4, %p151_p3 }
   0xa   : > { %p478_p7 = scmp.ge.s32.totalorder %s657_s21, 1  ;;  %p189_p8 = scmp.lt.s32.totalorder %s657_s21, 3 }
   0xc   : > { %p190_p9 = pnand %p478_p7, %p189_p8 }
   0xd   : > { %p216_p10 = scmp.lt.s32.totalorder (!%p190_p9), %s713_s22, 1  ;;  %s213_s26 = sand.u32 (!%p190_p9), 1, %s649_s19  }
   0xe   : > { %193 = sbr.rel (%p190_p9) target bundleno = 435 (0x1b3), region = 40  ;;  %s479_s30 = sshll.u32 (!%p190_p9), %s213_s26, 3 }
   0xf   : > { %s485_s8 = sshll.u32 (!%p190_p9), %s713_s22, 7  ;;  %s215_s9 = scalar_lea.vmem (!%p190_p9), [#allocation2], %s479_s30 }
  0x10   : > { %s416_s10 = sshll.u32 (!%p190_p9), %s215_s9, 4  ;;  %s414_s13 = scalar_lea.hbm (!%p190_p9), %s876_s5, %s485_s8  ;;  %s417_s10 = int_to_ptr.vmem [resolvable:$true] %s416_s10 }
  0x11   : > { %s403_s14 = scalar_lea.sflag (!%p190_p9), [#allocation3], %s213_s26  ;;  %s597_s15 = scalar_lea.vmem (!%p190_p9), %s417_s10, 128 }
  0x12   : > { %p598_p11 = scmp.ne.s32.totalorder (!%p190_p9), %s417_s10, %s597_s15 }
  0x13   : > { %v224_v0 = vld [vmem:[%s872_s1 + $0x18] sm:$0xff]  ;;  %v659_v1 = vmov 0.0   ;;  %v223_v2 = vld [vmem:[%s872_s1 + $0x10] sm:$0xff]  ;;  %vm660_vm0 = vmmov 0   ;;  %s217_s11 = scalar_select %p216_p10, %s713_s22, 1  ;;  %v222_v5 = vld [vmem:[%s872_s1 + $0x8] sm:$0xff] }
  0x14   : > { %510 = vmatprep.subr.mxu0 %v659_v1  ;;  %518 = vmatprep.mubr.msk.f32.mxu0 %vm660_vm0, %v659_v1  ;;  %v322_v3 = vld [vmem:[%s874_s3 + $0x78] sm:$0xff]  ;;  %v321_v4 = vld [vmem:[%s874_s3 + $0x70] sm:$0xff]  ;;  %v320_v6 = vld [vmem:[%s874_s3 + $0x68] sm:$0xff]  ;;  %vm232_vm1 = vcmask 261120   ;;  %p599_p12 = pnand %p598_p11, %p730_p5 }
  0x15   : > { %511 = vmatpush3.msra.mxu0 %v224_v0  ;;  %521 = vmatprep.subr.mxu1 %v659_v1  ;;  %s480_s16 = sshll.u32 %s217_s11, 3  ;;  %v221_v7 = vld [vmem:[%s872_s1] sm:$0xff]  ;;  %v318_v10 = vld [vmem:[%s874_s3 + $0x58] sm:$0xff]  ;;  %v317_v11 = vld [vmem:[%s874_s3 + $0x50] sm:$0xff] }
  0x16   : > { %512 = vmatprep.subr.mxu0 %v659_v1  ;;  %522 = vmatpush3.msra.mxu1 %v322_v3  ;;  %s219_s7 = scalar_lea.vmem %s871_s0, %s480_s16  ;;  %v319_v9 = vld [vmem:[%s874_s3 + $0x60] sm:$0xff]  ;;  %v316_v12 = vld [vmem:[%s874_s3 + $0x48] sm:$0xff]  ;;  %v314_v14 = vld [vmem:[%s874_s3 + $0x38] sm:$0xff]  ;;  %p600_p13 = pneg %p599_p12 }
  0x17   : > { %513 = vmatpush3.msra.mxu0 %v223_v2  ;;  %523 = vmatprep.subr.mxu1 %v659_v1  ;;  %v220_v8 = vld [vmem:[%s219_s7] sm:$0xff]  ;;  %v313_v15 = vld [vmem:[%s874_s3 + $0x30] sm:$0xff]  ;;  %v312_v16 = vld [vmem:[%s874_s3 + $0x28] sm:$0xff]  ;;  %s661_s16 = smov [#allocation2]  }
  0x18   : > { %514 = vmatprep.subr.mxu0 %v659_v1  ;;  %524 = vmatpush3.msra.mxu1 %v321_v4  ;;  %v315_v13 = vld [vmem:[%s874_s3 + $0x40] sm:$0xff]  ;;  %v310_v18 = vld [vmem:[%s874_s3 + $0x18] sm:$0xff]  ;;  %v309_v19 = vld [vmem:[%s874_s3 + $0x10] sm:$0xff]  ;;  %s601_s22 = sshll.u32 %s661_s16, 4  ;;  %s602_s22 = int_to_ptr.vmem [resolvable:$false] %s601_s22 }
  0x19   : > { %515 = vmatpush3.msra.mxu0 %v222_v5  ;;  %525 = vmatprep.subr.mxu1 %v659_v1  ;;  %v311_v17 = vld [vmem:[%s874_s3 + $0x20] sm:$0xff]  ;;  %v308_v20 = vld [vmem:[%s874_s3 + $0x8] sm:$0xff]  ;;  %s603_s17 = scalar_lea.vmem %s602_s22, 256  ;;  %p604_p0 = scmp.lt.s32.totalorder %s417_s10, %s602_s22 }
  0x1a   : > { %516 = vmatprep.subr.mxu0 %v659_v1  ;;  %526 = vmatpush3.msra.mxu1 %v320_v6  ;;  %v307_v21 = vld [vmem:[%s874_s3] sm:$0xff]  ;;  %p605_p1 = scmp.lt.s32.totalorder %s603_s17, %s597_s15 }
  0x1b   : > { %517 = vmatpush3.msra.mxu0 %v221_v7  ;;  %527 = vmatprep.subr.mxu1 %v659_v1  ;;  %v481_v22 = vld [vmem:[%s873_s2] ss:$0 sm:$0xff] }
  0x1c   : > { %519 = vmatmul.mubr.msk.f32.vlgmr.msra.gmra.mxu0 %vm232_vm1, %v220_v8  ;;  %528 = vmatpush3.msra.mxu1 %v319_v9  ;;  %v483_v27 = vld [vmem:[%s875_s4] ss:$0 sm:$0xff]  ;;  %p606_p2 = por %p605_p1, %p604_p0 }
  0x1d   : > { %529 = vmatprep.subr.mxu1 %v659_v1  ;;  %553 = vmatprep.mubr.msk.f32.mxu1 %vm660_vm0, %v659_v1 }
  0x1e   : > { %530 = vmatpush3.msra.mxu1 %v318_v10  ;;  %p607_p3 = pnand %p606_p2, %p600_p13 }
  0x1f   : > { %531 = vmatprep.subr.mxu1 %v659_v1 }
  0x20   : > { %532 = vmatpush3.msra.mxu1 %v317_v11 }
  0x21   : > { %533 = vmatprep.subr.mxu1 %v659_v1 }
  0x22   : > { %534 = vmatpush3.msra.mxu1 %v316_v12 }
  0x23   : > { %535 = vmatprep.subr.mxu1 %v659_v1 }
  0x24   : > { %536 = vmatpush3.msra.mxu1 %v315_v13 }
  0x25   : > { %537 = vmatprep.subr.mxu1 %v659_v1 }
  0x26   : > { %538 = vmatpush3.msra.mxu1 %v314_v14 }
  0x27   : > { %539 = vmatprep.subr.mxu1 %v659_v1 }
  0x28   : > { %540 = vmatpush3.msra.mxu1 %v313_v15 }
  0x29   : > { %541 = vmatprep.subr.mxu1 %v659_v1 }
  0x2a   : > { %542 = vmatpush3.msra.mxu1 %v312_v16 }
  0x2b   : > { %543 = vmatprep.subr.mxu1 %v659_v1 }
  0x2c   : > { %544 = vmatpush3.msra.mxu1 %v311_v17 }
  0x2d   : > { %545 = vmatprep.subr.mxu1 %v659_v1 }
  0x2e   : > { %546 = vmatpush3.msra.mxu1 %v310_v18 }
  0x2f   : > { %547 = vmatprep.subr.mxu1 %v659_v1 }
  0x30   : > { %548 = vmatpush3.msra.mxu1 %v309_v19 }
  0x31   : > { %549 = vmatprep.subr.mxu1 %v659_v1 }
  0x32   : > { %550 = vmatpush3.msra.mxu1 %v308_v20 }
  0x33   : > { %551 = vmatprep.subr.mxu1 %v659_v1 }
  0x34   : > { %552 = vmatpush3.msra.mxu1 %v307_v21 }
  0xdc   : > { %v302_v23 = vpop.f32.mrf.mxu0 }
  0xdd   : > { %v303_v24 = vadd.f32 %v481_v22, %v302_v23 }
  0xde   : > { %v520_v25 = vpop.f32.mrf.mxu0 }
  0xdf   : > { %v306_v26 = vmax.f32 %v303_v24, 0.0 }
  0xe1   : > { %554 = vmatmul.mubr.f32.vlgmr.msra.gmra.mxu1 %v306_v26 }
 0x1a1   : > { %v396_v28 = vpop.f32.mrf.mxu1 }
 0x1a2   : > { %v397_v29 = vadd.f32 %v483_v27, %v396_v28 }
 0x1a3   : > { %v555_v30 = vpop.f32.mrf.mxu1 }
 0x1a4   : > { %v400_v31 = vadd.f32 %v397_v29, %v220_v8 }
 0x1a6   : > { %401 = vst.msk [vmem:[%s215_s9] sm:$0xff] %vm232_vm1, %v400_v31 }
 0x1a7   : > { %610 = shalt.err (!%p607_p3)
}
 0x1a8   : > { %s611_s23 = scalar_lea.hbm %s414_s13, 128  ;;  %s615_s30 = scalar_lea.hbm %s876_s5, 256 }
 0x1a9   : > { %p612_p4 = scmp.ne.s32.totalorder %s414_s13, %s611_s23  ;;  %p616_p9 = scmp.lt.s32.totalorder %s414_s13, %s876_s5 }
 0x1aa   : > { %p617_p10 = scmp.lt.s32.totalorder %s615_s30, %s611_s23 }
 0x1ab   : > { %p613_p7 = pnand %p612_p4, %p730_p5 }
 0x1ac   : > { %p618_p11 = por %p617_p10, %p616_p9 }
 0x1ad   : > { %p614_p8 = pneg %p613_p7 }
 0x1af   : > { %p619_p12 = pnand %p618_p11, %p614_p8 }
 0x1b1   : > { %622 = shalt.err (!%p619_p12)
}
 0x1b2   : > { %556 = dma.vmem_to_hbm [thread:$0]  (%p730_p5), %s417_s10, 128, %s414_s13, %s403_s14  }
 0x1b3 PF: > { %p562_p13 = scmp.ge.s32.totalorder %s657_s21, 2  ;;  %s428_s8 = sand.u32 1, %s645_s18  }
 0x1b4   : > { %s429_s9 = scalar_lea.sflag [#allocation3], %s428_s8 }
 0x1b5   : > { %p559_p0 = pnand %p562_p13, %p734_p6 }
 0x1b7   : > { %p560_p1 = pneg %p559_p0 }
 0x1b9   : > { %640 = dma.done.wait (%p560_p1), %s429_s9, 128  }
 0x1ba   : > { %642 = vsyncadd (%p560_p1), %s429_s9, 4294967168  ;;  %p15_p2 = scmp.ge.s32.totalorder %s717_s24, 4   ;;  %s879_s18 = smov %s649_s19 }
 0x1bb   : > { %s880_s19 = smov %s653_s20  ;;  %s881_s20 = smov %s728_s27 }
 0x1bc   : > { %s882_s21 = smov %s717_s24  ;;  %17 = sbr.rel (!%p15_p2) target bundleno = 3 (0x3), region = 75 }
 0x1c1   :  { %434 = vsyncpa [#allocation3], 1 }
 0x1c2   :  { %436 = vsyncpa [#allocation3 + $0x1], 1 }

</bundles_post_ra>
